<compile_context>
chip_gen: v7x
topology: tpu7x:2x2x1
jax: 0.10.0
libtpu: 0.0.40
codegen_flags: <defaults>
</compile_context>

<pallas_src>
import functools
import math

import jax
import jax.numpy as jnp
from jax import lax
from jax.experimental import pallas as pl
from jax.experimental.pallas import tpu as pltpu


def _attn_kernel(q_ref, k_ref, v_ref, o_ref, m_sc, l_sc, acc_sc,
                 *, scale, kv_tile, seq_valid, mask_kv):
    kv = pl.program_id(3)

    q = q_ref[...]                              # (Hb, C, Tq)   input dtype
    k = k_ref[...]                              # (Hb, C, Tkv)
    v = v_ref[...]                              # (Hb, C, Tkv)

    # Scale the (small) K tile once; mathematically identical to scaling both
    # q and k by ch**-0.25 as in the reference module.
    ks = k * jnp.asarray(scale, dtype=k_ref.dtype)

    # Logits with kv on sublanes, queries on lanes (no materialized transpose):
    #   s[h, s_kv, t_q] = sum_c k[h, c, s_kv] * q[h, c, t_q]
    s = lax.dot_general(
        ks, q,
        dimension_numbers=(((1,), (1,)), ((0,), (0,))),
        preferred_element_type=jnp.float32)     # (Hb, Tkv, Tq) f32

    if mask_kv:
        # Only emitted when T was padded; the penalty is a (1, Tkv, 1)
        # broadcast vector, not a full-size iota/compare/select each step.
        kv_pos = kv * kv_tile + lax.broadcasted_iota(
            jnp.int32, (1, kv_tile, 1), 1)
        penalty = jnp.where(kv_pos < seq_valid, 0.0, -1e30).astype(jnp.float32)
        s = s + penalty

    s_max = jnp.max(s, axis=1, keepdims=True)   # (Hb, 1, Tq)

    @pl.when(kv == 0)
    def _():
        # First kv tile: write stats/accumulator directly (alpha == 1,
        # acc == 0) -- no zero-fill and no accumulator read-modify-write.
        p = jnp.exp(s - s_max)
        m_sc[...] = s_max
        l_sc[...] = jnp.sum(p, axis=1, keepdims=True)
        acc_sc[...] = lax.dot_general(
            v, p.astype(v.dtype),
            dimension_numbers=(((2,), (1,)), ((0,), (0,))),
            preferred_element_type=jnp.float32)

    @pl.when(kv > 0)
    def _():
        m_prev = m_sc[...]
        m_new = jnp.maximum(m_prev, s_max)
        alpha = jnp.exp(m_prev - m_new)         # (Hb, 1, Tq)
        p = jnp.exp(s - m_new)                  # (Hb, Tkv, Tq) f32
        l_sc[...] = alpha * l_sc[...] + jnp.sum(p, axis=1, keepdims=True)
        m_sc[...] = m_new
        pv = lax.dot_general(
            v, p.astype(v.dtype),
            dimension_numbers=(((2,), (1,)), ((0,), (0,))),
            preferred_element_type=jnp.float32)  # (Hb, C, Tq)
        acc_sc[...] = alpha * acc_sc[...] + pv

    @pl.when(kv == pl.num_programs(3) - 1)
    def _():
        # Exact reciprocal: runs once per Q block, accuracy is cheap here.
        inv_l = 1.0 / l_sc[...]                 # (Hb, 1, Tq)
        o_ref[...] = (acc_sc[...] * inv_l).astype(o_ref.dtype)


def _vmem_capacity_bytes():
    """Best-effort per-TensorCore VMEM capacity; conservative on failure."""
    kind = ""
    try:
        kind = jax.devices()[0].device_kind.lower()
    except Exception:
        pass
    if "v7" in kind or "7x" in kind:            # v7x: 64 MiB per TC
        return 64 * 1024 * 1024
    try:
        cap = getattr(pltpu.get_tpu_info(), "vmem_capacity_bytes", None)
        if cap:
            return int(cap)
    except Exception:
        pass
    if any(tag in kind for tag in ("v4", "v5", "v6")):
        return 128 * 1024 * 1024
    return 64 * 1024 * 1024                     # unknown part: assume small VMEM


def _plan_tiles(n_heads, ch, t_pad, itemsize, vmem_cap):
    """Pick (head-batch, Tq, Tkv, vmem_limit), generation-aware."""
    small_vmem = vmem_cap <= 72 * 1024 * 1024   # v7x-class parts
    if small_vmem:
        budget = 28 * 1024 * 1024
        vmem_limit = 48 * 1024 * 1024
        tile_cap = 512
    else:                                        # 128 MiB parts (v5e / v6e)
        budget = 64 * 1024 * 1024
        vmem_limit = 96 * 1024 * 1024
        tile_cap = 1024

    tiles = [t for t in (1024, 768, 512, 384, 256, 128)
             if t <= min(tile_cap, t_pad) and t_pad % t == 0]
    if not tiles:
        tiles = [t_pad]
    head_divs = [d for d in range(1, n_heads + 1) if n_heads % d == 0]

    def footprint(hb, t_q, t_kv):
        io = 2 * hb * ch * (t_q + 2 * t_kv) * itemsize   # dbl-buffered q, k, v
        io += 2 * hb * ch * t_q * itemsize               # dbl-buffered out
        scratch = hb * ch * t_q * 4 + 2 * hb * t_q * 4   # acc + m + l (f32)
        temps = 2 * hb * t_kv * t_q * 4                  # logits + exp (f32)
        return io + scratch + temps

    best = None
    for hb in head_divs:
        for t_q in tiles:
            for t_kv in tiles:
                if footprint(hb, t_q, t_kv) > budget:
                    continue
                # Fewest grid steps first, then fewer accumulator rescales
                # (bigger Tkv), then fewer K/V re-reads (bigger Tq).
                key = (hb * t_q * t_kv, t_kv, t_q, hb)
                if best is None or key > best[0]:
                    best = (key, (hb, t_q, t_kv))
    if best is None:
        return 1, tiles[-1], tiles[-1], vmem_limit
    hb, t_q, t_kv = best[1]
    return hb, t_q, t_kv, vmem_limit


def single_modal_qkv_attention(qkv, n_heads, *, max_tile=None):
    """qkv: [N, 3*H*C, T] -> [N, H*C, T]  (matches the PyTorch module)."""
    bs, width, length = qkv.shape
    assert width % (3 * n_heads) == 0
    ch = width // (3 * n_heads)

    # Free view: [N, 3*H*C, T] -> [N, 3, H, C, T] (splits a major axis only).
    qkv5 = qkv.reshape(bs, 3, n_heads, ch, length)

    # Lane-dense sequence dim: pad T to a multiple of 128, slice afterwards.
    t_pad = ((length + 127) // 128) * 128
    if t_pad != length:
        qkv5 = jnp.pad(qkv5, [(0, 0)] * 4 + [(0, t_pad - length)])

    vmem_cap = _vmem_capacity_bytes()
    hb, t_q, t_kv, vmem_limit = _plan_tiles(n_heads, ch, t_pad,
                                            qkv.dtype.itemsize, vmem_cap)
    if max_tile is not None:                     # test hook: force small tiles
        t_q = min(t_q, max_tile)
        t_kv = min(t_kv, max_tile)

    grid = (bs, n_heads // hb, t_pad // t_q, t_pad // t_kv)

    kernel = functools.partial(
        _attn_kernel,
        scale=1.0 / math.sqrt(ch),               # (ch**-0.25)**2 applied once
        kv_tile=t_kv,
        seq_valid=length,
        mask_kv=(t_pad != length),
    )

    # All three operands come straight out of the [N, 3, H, C, T] qkv view;
    # only the index along the "3" axis differs.
    q_spec = pl.BlockSpec((None, None, hb, ch, t_q),
                          lambda n, g, tq, kv: (n, 0, g, 0, tq))
    k_spec = pl.BlockSpec((None, None, hb, ch, t_kv),
                          lambda n, g, tq, kv: (n, 1, g, 0, kv))
    v_spec = pl.BlockSpec((None, None, hb, ch, t_kv),
                          lambda n, g, tq, kv: (n, 2, g, 0, kv))
    o_spec = pl.BlockSpec((None, hb, ch, t_q),
                          lambda n, g, tq, kv: (n, g, 0, tq))

    itemsize = qkv.dtype.itemsize
    bh = bs * n_heads
    cost = pl.CostEstimate(
        flops=4 * bh * ch * t_pad * t_pad,
        transcendentals=bh * t_pad * t_pad,
        bytes_accessed=bh * ch * t_pad * itemsize * (2 + 2 * (t_pad // t_q)),
    )

    out = pl.pallas_call(
        kernel,
        out_shape=jax.ShapeDtypeStruct((bs, n_heads, ch, t_pad), qkv.dtype),
        grid_spec=pltpu.PrefetchScalarGridSpec(
            num_scalar_prefetch=0,
            grid=grid,
            in_specs=[q_spec, k_spec, v_spec],
            out_specs=o_spec,
            scratch_shapes=[
                pltpu.VMEM((hb, 1, t_q), jnp.float32),   # running max m
                pltpu.VMEM((hb, 1, t_q), jnp.float32),   # running sum l
                pltpu.VMEM((hb, ch, t_q), jnp.float32),  # f32 accumulator
            ],
        ),
        compiler_params=pltpu.CompilerParams(
            dimension_semantics=("parallel", "parallel", "parallel",
                                 "arbitrary"),
            vmem_limit_bytes=vmem_limit,
        ),
        cost_estimate=cost,
    )(qkv5, qkv5, qkv5)

    if t_pad != length:
        out = out[:, :, :, :length]
    return out.reshape(bs, n_heads * ch, length)


def _reference(qkv, n_heads):
    bs, width, length = qkv.shape
    ch = width // (3 * n_heads)
    q, k, v = jnp.split(qkv, 3, axis=1)
    q = q.reshape(bs * n_heads, ch, length)
    k = k.reshape(bs * n_heads, ch, length)
    v = v.reshape(bs * n_heads, ch, length)
    scale = 1.0 / math.sqrt(math.sqrt(ch))
    w = jnp.einsum('bct,bcs->bts', q * scale, k * scale)
    w = jax.nn.softmax(w.astype(jnp.float32), axis=-1).astype(w.dtype)
    a = jnp.einsum('bts,bcs->bct', w, v)
    return a.reshape(bs, -1, length)


if __name__ == "__main__":
    n_heads = 2
    bs, ch = 2, 8
    width = 3 * n_heads * ch  # 48

    # Case 1: small T (exercises the kv-padding mask path), matches module spec.
    length = 16
    qkv = jax.random.normal(jax.random.PRNGKey(0), (bs, width, length),
                            dtype=jnp.float32)
    out = jax.block_until_ready(single_modal_qkv_attention(qkv, n_heads))
    ref = _reference(qkv, n_heads)
    assert out.shape == (bs, n_heads * ch, length)
    assert bool(jnp.allclose(out, ref, atol=2e-3, rtol=2e-3)), \
        float(jnp.max(jnp.abs(out - ref)))

    # Case 2: multiple q/kv tiles (exercises the online-softmax update path).
    length2 = 300
    qkv2 = jax.random.normal(jax.random.PRNGKey(1), (bs, width, length2),
                             dtype=jnp.float32)
    out2 = jax.block_until_ready(
        single_modal_qkv_attention(qkv2, n_heads, max_tile=128))
    ref2 = _reference(qkv2, n_heads)
    assert out2.shape == (bs, n_heads * ch, length2)
    assert bool(jnp.allclose(out2, ref2, atol=2e-3, rtol=2e-3)), \
        float(jnp.max(jnp.abs(out2 - ref2)))

    print("KERNEL_OK")
</pallas_src>

<mosaic_0001>
module attributes {stable_mosaic.version = 11 : i64} {
  func.func @_attn_kernel(%arg0: i32, %arg1: i32, %arg2: i32, %arg3: i32, %arg4: memref<1x1x2x8x128xf32, #tpu.memory_space<vmem>>, %arg5: memref<1x1x2x8x128xf32, #tpu.memory_space<vmem>>, %arg6: memref<1x1x2x8x128xf32, #tpu.memory_space<vmem>>, %arg7: memref<1x2x8x128xf32, #tpu.memory_space<vmem>>, %arg8: memref<2x1x128xf32, #tpu.memory_space<vmem>>, %arg9: memref<2x1x128xf32, #tpu.memory_space<vmem>>, %arg10: memref<2x8x128xf32, #tpu.memory_space<vmem>>) attributes {dimension_semantics = [#tpu.dimension_semantics<parallel>, #tpu.dimension_semantics<parallel>, #tpu.dimension_semantics<parallel>, #tpu.dimension_semantics<arbitrary>], iteration_bounds = array<i64: 2, 1, 1, 1>, scalar_prefetch = 0 : i64, scratch_operands = 3 : i64, tpu.core_type = #tpu.core_type<tc>, window_params = [{transform_indices = @transform_0, window_bounds = array<i64: 1, 1, 2, 8, 128>}, {transform_indices = @transform_1, window_bounds = array<i64: 1, 1, 2, 8, 128>}, {transform_indices = @transform_2, window_bounds = array<i64: 1, 1, 2, 8, 128>}, {transform_indices = @transform_3, window_bounds = array<i64: 1, 2, 8, 128>}]} {
    %c0 = arith.constant 0 : index
    %c0_0 = arith.constant 0 : index
    %c0_1 = arith.constant 0 : index
    %c0_2 = arith.constant 0 : index
    %c0_3 = arith.constant 0 : index
    %0 = vector.load %arg4[%c0, %c0_0, %c0_1, %c0_2, %c0_3] : memref<1x1x2x8x128xf32, #tpu.memory_space<vmem>>, vector<1x1x2x8x128xf32>
    %1 = vector.shape_cast %0 : vector<1x1x2x8x128xf32> to vector<2x8x128xf32>
    %c0_4 = arith.constant 0 : index
    %c0_5 = arith.constant 0 : index
    %c0_6 = arith.constant 0 : index
    %c0_7 = arith.constant 0 : index
    %c0_8 = arith.constant 0 : index
    %2 = vector.load %arg5[%c0_4, %c0_5, %c0_6, %c0_7, %c0_8] : memref<1x1x2x8x128xf32, #tpu.memory_space<vmem>>, vector<1x1x2x8x128xf32>
    %3 = vector.shape_cast %2 : vector<1x1x2x8x128xf32> to vector<2x8x128xf32>
    %c0_9 = arith.constant 0 : index
    %c0_10 = arith.constant 0 : index
    %c0_11 = arith.constant 0 : index
    %c0_12 = arith.constant 0 : index
    %c0_13 = arith.constant 0 : index
    %4 = vector.load %arg6[%c0_9, %c0_10, %c0_11, %c0_12, %c0_13] : memref<1x1x2x8x128xf32, #tpu.memory_space<vmem>>, vector<1x1x2x8x128xf32>
    %5 = vector.shape_cast %4 : vector<1x1x2x8x128xf32> to vector<2x8x128xf32>
    %cst = arith.constant 0.353553385 : f32
    %6 = vector.broadcast %cst : f32 to vector<2x8x128xf32>
    %7 = arith.mulf %3, %6 : vector<2x8x128xf32>
    %cst_14 = arith.constant dense<0.000000e+00> : vector<2x128x128xf32>
    %8 = tpu.matmul %7, %1, %cst_14 {dimension_numbers = #tpu.dot_dimension_numbers<[1], [1], [2], [2], [0, 0, 0, 2, 1, 2], [0], [0]>} : vector<2x8x128xf32>, vector<2x8x128xf32>, vector<2x128x128xf32> -> vector<2x128x128xf32>
    %c128_i32 = arith.constant 128 : i32
    %9 = arith.muli %arg3, %c128_i32 : i32
    %10 = tpu.iota {dimensions = array<i32: 1>} : vector<1x128x1xi32>
    %11 = vector.broadcast %9 : i32 to vector<1x128x1xi32>
    %12 = arith.addi %11, %10 : vector<1x128x1xi32>
    %c16_i32 = arith.constant 16 : i32
    %13 = vector.broadcast %c16_i32 : i32 to vector<1x128x1xi32>
    %14 = arith.cmpi slt, %12, %13 : vector<1x128x1xi32>
    %cst_15 = arith.constant 0.000000e+00 : f32
    %cst_16 = arith.constant -1.000000e+30 : f32
    %15 = vector.broadcast %cst_15 : f32 to vector<1x128x1xf32>
    %16 = vector.broadcast %cst_16 : f32 to vector<1x128x1xf32>
    %17 = arith.select %14, %15, %16 : vector<1x128x1xi1>, vector<1x128x1xf32>
    %18 = vector.broadcast %17 : vector<1x128x1xf32> to vector<2x128x128xf32>
    %19 = arith.addf %8, %18 : vector<2x128x128xf32>
    %cst_17 = arith.constant dense<0xFF800000> : vector<2x128xf32>
    %20 = vector.multi_reduction <maximumf>, %19, %cst_17 [1] : vector<2x128x128xf32> to vector<2x128xf32>
    %21 = vector.shape_cast %20 : vector<2x128xf32> to vector<2x1x128xf32>
    %c0_i32 = arith.constant 0 : i32
    %22 = arith.cmpi eq, %arg3, %c0_i32 : i32
    %23 = arith.extui %22 : i1 to i32
    %c0_i32_18 = arith.constant 0 : i32
    %24 = arith.cmpi ne, %23, %c0_i32_18 : i32
    scf.if %24 {
      %31 = vector.broadcast %21 : vector<2x1x128xf32> to vector<2x128x128xf32>
      %32 = arith.subf %19, %31 : vector<2x128x128xf32>
      %33 = math.exp %32 : vector<2x128x128xf32>
      %c0_23 = arith.constant 0 : index
      %c0_24 = arith.constant 0 : index
      %c0_25 = arith.constant 0 : index
      %34 = vector.load %arg8[%c0_23, %c0_24, %c0_25] : memref<2x1x128xf32, #tpu.memory_space<vmem>>, vector<2x1x128xf32>
      tpu.vector_store %arg8[%c0_23, %c0_24, %c0_25], %21 {strides = array<i32>} : memref<2x1x128xf32, #tpu.memory_space<vmem>>, vector<2x1x128xf32>,
      %cst_26 = arith.constant dense<0.000000e+00> : vector<2x128xf32>
      %35 = vector.multi_reduction <add>, %33, %cst_26 [1] : vector<2x128x128xf32> to vector<2x128xf32>
      %36 = vector.shape_cast %35 : vector<2x128xf32> to vector<2x1x128xf32>
      %c0_27 = arith.constant 0 : index
      %c0_28 = arith.constant 0 : index
      %c0_29 = arith.constant 0 : index
      %37 = vector.load %arg9[%c0_27, %c0_28, %c0_29] : memref<2x1x128xf32, #tpu.memory_space<vmem>>, vector<2x1x128xf32>
      tpu.vector_store %arg9[%c0_27, %c0_28, %c0_29], %36 {strides = array<i32>} : memref<2x1x128xf32, #tpu.memory_space<vmem>>, vector<2x1x128xf32>,
      %cst_30 = arith.constant dense<0.000000e+00> : vector<2x8x128xf32>
      %38 = tpu.matmul %5, %33, %cst_30 {dimension_numbers = #tpu.dot_dimension_numbers<[2], [1], [1], [2], [0, 0, 0, 1, 1, 2], [0], [0]>} : vector<2x8x128xf32>, vector<2x128x128xf32>, vector<2x8x128xf32> -> vector<2x8x128xf32>
      %c0_31 = arith.constant 0 : index
      %c0_32 = arith.constant 0 : index
      %c0_33 = arith.constant 0 : index
      %39 = vector.load %arg10[%c0_31, %c0_32, %c0_33] : memref<2x8x128xf32, #tpu.memory_space<vmem>>, vector<2x8x128xf32>
      tpu.vector_store %arg10[%c0_31, %c0_32, %c0_33], %38 {strides = array<i32>} : memref<2x8x128xf32, #tpu.memory_space<vmem>>, vector<2x8x128xf32>,
    } else {
    }
    %c0_i32_19 = arith.constant 0 : i32
    %25 = arith.cmpi sgt, %arg3, %c0_i32_19 : i32
    %26 = arith.extui %25 : i1 to i32
    %c0_i32_20 = arith.constant 0 : i32
    %27 = arith.cmpi ne, %26, %c0_i32_20 : i32
    scf.if %27 {
      %c0_23 = arith.constant 0 : index
      %c0_24 = arith.constant 0 : index
      %c0_25 = arith.constant 0 : index
      %31 = vector.load %arg8[%c0_23, %c0_24, %c0_25] : memref<2x1x128xf32, #tpu.memory_space<vmem>>, vector<2x1x128xf32>
      %32 = arith.maximumf %31, %21 : vector<2x1x128xf32>
      %33 = arith.subf %31, %32 : vector<2x1x128xf32>
      %34 = math.exp %33 : vector<2x1x128xf32>
      %35 = vector.broadcast %32 : vector<2x1x128xf32> to vector<2x128x128xf32>
      %36 = arith.subf %19, %35 : vector<2x128x128xf32>
      %37 = math.exp %36 : vector<2x128x128xf32>
      %c0_26 = arith.constant 0 : index
      %c0_27 = arith.constant 0 : index
      %c0_28 = arith.constant 0 : index
      %38 = vector.load %arg9[%c0_26, %c0_27, %c0_28] : memref<2x1x128xf32, #tpu.memory_space<vmem>>, vector<2x1x128xf32>
      %39 = arith.mulf %34, %38 : vector<2x1x128xf32>
      %cst_29 = arith.constant dense<0.000000e+00> : vector<2x128xf32>
      %40 = vector.multi_reduction <add>, %37, %cst_29 [1] : vector<2x128x128xf32> to vector<2x128xf32>
      %41 = vector.shape_cast %40 : vector<2x128xf32> to vector<2x1x128xf32>
      %42 = arith.addf %39, %41 : vector<2x1x128xf32>
      %c0_30 = arith.constant 0 : index
      %c0_31 = arith.constant 0 : index
      %c0_32 = arith.constant 0 : index
      %43 = vector.load %arg9[%c0_30, %c0_31, %c0_32] : memref<2x1x128xf32, #tpu.memory_space<vmem>>, vector<2x1x128xf32>
      tpu.vector_store %arg9[%c0_30, %c0_31, %c0_32], %42 {strides = array<i32>} : memref<2x1x128xf32, #tpu.memory_space<vmem>>, vector<2x1x128xf32>,
      %c0_33 = arith.constant 0 : index
      %c0_34 = arith.constant 0 : index
      %c0_35 = arith.constant 0 : index
      %44 = vector.load %arg8[%c0_33, %c0_34, %c0_35] : memref<2x1x128xf32, #tpu.memory_space<vmem>>, vector<2x1x128xf32>
      tpu.vector_store %arg8[%c0_33, %c0_34, %c0_35], %32 {strides = array<i32>} : memref<2x1x128xf32, #tpu.memory_space<vmem>>, vector<2x1x128xf32>,
      %cst_36 = arith.constant dense<0.000000e+00> : vector<2x8x128xf32>
      %45 = tpu.matmul %5, %37, %cst_36 {dimension_numbers = #tpu.dot_dimension_numbers<[2], [1], [1], [2], [0, 0, 0, 1, 1, 2], [0], [0]>} : vector<2x8x128xf32>, vector<2x128x128xf32>, vector<2x8x128xf32> -> vector<2x8x128xf32>
      %c0_37 = arith.constant 0 : index
      %c0_38 = arith.constant 0 : index
      %c0_39 = arith.constant 0 : index
      %46 = vector.load %arg10[%c0_37, %c0_38, %c0_39] : memref<2x8x128xf32, #tpu.memory_space<vmem>>, vector<2x8x128xf32>
      %47 = vector.broadcast %34 : vector<2x1x128xf32> to vector<2x8x128xf32>
      %48 = arith.mulf %47, %46 : vector<2x8x128xf32>
      %49 = arith.addf %48, %45 : vector<2x8x128xf32>
      %c0_40 = arith.constant 0 : index
      %c0_41 = arith.constant 0 : index
      %c0_42 = arith.constant 0 : index
      %50 = vector.load %arg10[%c0_40, %c0_41, %c0_42] : memref<2x8x128xf32, #tpu.memory_space<vmem>>, vector<2x8x128xf32>
      tpu.vector_store %arg10[%c0_40, %c0_41, %c0_42], %49 {strides = array<i32>} : memref<2x8x128xf32, #tpu.memory_space<vmem>>, vector<2x8x128xf32>,
    } else {
    }
    %c0_i32_21 = arith.constant 0 : i32
    %28 = arith.cmpi eq, %arg3, %c0_i32_21 : i32
    %29 = arith.extui %28 : i1 to i32
    %c0_i32_22 = arith.constant 0 : i32
    %30 = arith.cmpi ne, %29, %c0_i32_22 : i32
    scf.if %30 {
      %c0_23 = arith.constant 0 : index
      %c0_24 = arith.constant 0 : index
      %c0_25 = arith.constant 0 : index
      %31 = vector.load %arg9[%c0_23, %c0_24, %c0_25] : memref<2x1x128xf32, #tpu.memory_space<vmem>>, vector<2x1x128xf32>
      %cst_26 = arith.constant 1.000000e+00 : f32
      %32 = vector.broadcast %cst_26 : f32 to vector<2x1x128xf32>
      %33 = arith.divf %32, %31 : vector<2x1x128xf32>
      %c0_27 = arith.constant 0 : index
      %c0_28 = arith.constant 0 : index
      %c0_29 = arith.constant 0 : index
      %34 = vector.load %arg10[%c0_27, %c0_28, %c0_29] : memref<2x8x128xf32, #tpu.memory_space<vmem>>, vector<2x8x128xf32>
      %35 = vector.broadcast %33 : vector<2x1x128xf32> to vector<2x8x128xf32>
      %36 = arith.mulf %34, %35 : vector<2x8x128xf32>
      %c0_30 = arith.constant 0 : index
      %c0_31 = arith.constant 0 : index
      %c0_32 = arith.constant 0 : index
      %c0_33 = arith.constant 0 : index
      %37 = vector.load %arg7[%c0_30, %c0_31, %c0_32, %c0_33] : memref<1x2x8x128xf32, #tpu.memory_space<vmem>>, vector<1x2x8x128xf32>
      %38 = vector.shape_cast %37 : vector<1x2x8x128xf32> to vector<2x8x128xf32>
      %39 = vector.shape_cast %36 : vector<2x8x128xf32> to vector<1x2x8x128xf32>
      tpu.vector_store %arg7[%c0_30, %c0_31, %c0_32, %c0_33], %39 {strides = array<i32>} : memref<1x2x8x128xf32, #tpu.memory_space<vmem>>, vector<1x2x8x128xf32>,
    } else {
    }
    return
  }
  func.func @transform_0(%arg0: i32, %arg1: i32, %arg2: i32, %arg3: i32) -> (i32, i32, i32, i32, i32) {
    %c0_i32 = arith.constant 0 : i32
    %c0_i32_0 = arith.constant 0 : i32
    %c0_i32_1 = arith.constant 0 : i32
    return %arg0, %c0_i32, %arg1, %c0_i32_0, %arg2 : i32, i32, i32, i32, i32
  }
  func.func @transform_1(%arg0: i32, %arg1: i32, %arg2: i32, %arg3: i32) -> (i32, i32, i32, i32, i32) {
    %c1_i32 = arith.constant 1 : i32
    %c0_i32 = arith.constant 0 : i32
    %c0_i32_0 = arith.constant 0 : i32
    return %arg0, %c1_i32, %arg1, %c0_i32, %arg3 : i32, i32, i32, i32, i32
  }
  func.func @transform_2(%arg0: i32, %arg1: i32, %arg2: i32, %arg3: i32) -> (i32, i32, i32, i32, i32) {
    %c2_i32 = arith.constant 2 : i32
    %c0_i32 = arith.constant 0 : i32
    %c0_i32_0 = arith.constant 0 : i32
    return %arg0, %c2_i32, %arg1, %c0_i32, %arg3 : i32, i32, i32, i32, i32
  }
  func.func @transform_3(%arg0: i32, %arg1: i32, %arg2: i32, %arg3: i32) -> (i32, i32, i32, i32) {
    %c0_i32 = arith.constant 0 : i32
    %c0_i32_0 = arith.constant 0 : i32
    return %arg0, %arg1, %c0_i32, %arg2 : i32, i32, i32, i32
  }
}

</mosaic_0001>

<bundles_post_ra>
// kernel: tpu_custom_call.1
= control target key start
LH: loop header
LB: loop body
LE: loop exit
PB: predicated region body
PF: predicated region fallthrough
CT: control target
= control target key end

     0   :  { %s2815_s0 = inlined_call_operand.hbm [shape: f32[2,3,2,8,128], index: 0, kind: input, shape index: {}]   ;;  %s2816_s1 = inlined_call_operand.hbm [shape: f32[2,3,2,8,128], index: 1, kind: input, shape index: {}]   ;;  %s2817_s2 = inlined_call_operand.hbm [shape: f32[2,3,2,8,128], index: 2, kind: input, shape index: {}]   ;;  %s2818_s3 = inlined_call_operand.hbm [shape: f32[2,2,8,128], index: 3, kind: output, shape index: {}]  }
   0x1   :  { %2828 = sst [smem:[#allocation17_spill]] %s2815_s0 }
   0x2   :  { %2829 = sst [smem:[#allocation18_spill]] %s2816_s1 }
   0x3   :  { %8 = vsyncpa [#allocation6], 0 }
   0x4   :  { %10 = vsyncpa [#allocation6 + $0x1], 0 }
   0x5   :  { %11 = vsyncpa [#allocation9], 0 }
   0x6   :  { %13 = vsyncpa [#allocation9 + $0x1], 0 }
   0x7   :  { %14 = vsyncpa [#allocation7], 0 }
   0x8   :  { %16 = vsyncpa [#allocation7 + $0x1], 0  ;;  %s2355_s12 = smov 0   ;;  %s2357_s13 = smov 0  }
   0x9   :  { %s2359_s14 = smov 0   ;;  %s2361_s15 = smov 0  }
   0xa   :  { %s2363_s16 = smov 0   ;;  %s2365_s17 = smov 0  }
   0xb LB: > { %2830 = sst [smem:[#allocation15_spill]] %s2318_s16  ;;  %s2386_s18 = sadd.s32 4294967295, %s2322_s17   ;;  %s2322_s17 = sphi %s2365_s17, %s22_s17   ;;  %s2318_s16 = sphi %s2363_s16, %s2851_s16   ;;  %s2314_s15 = sphi %s2361_s15, %s2850_s15   ;;  %s2310_s14 = sphi %s2359_s14, %s2854_s14   ;;  %s2306_s13 = sphi %s2357_s13, %s2853_s13   ;;  %s2302_s12 = sphi %s2355_s12, %s2852_s12  }
   0xc   : > { %s1706_s19 = sadd.s32 4294967294, %s2322_s17   ;;  %s48_s20 = sadd.s32 1, %s2318_s16 }
   0xd   : > { %s59_s21 = sadd.s32 1, %s2310_s14  ;;  %p50_p0 = scmp.ge.s32.totalorder %s48_s20, 2 }
   0xe   : > { %p66_p1 = scmp.ne.s32.totalorder %s2310_s14, %s2306_s13  ;;  %p67_p2 = scmp.eq.s32.totalorder %s2322_s17, 0 }
   0xf   : > { %p72_p3 = scmp.ne.s32.totalorder %s2306_s13, %s2302_s12  ;;  %s2856_s20 = smov (%p50_p0, %s48_s20), 0 }
  0x10   : > { %2831 = sst [smem:[#allocation16_spill]] %s2856_s20  ;;  %p2398_p4 = por %p67_p2, %p66_p1 }
  0x11   : > { %p73_p5 = scmp.eq.s32.totalorder %s2386_s18, 0  ;;  %s52_s23 = ssub.s32 %s2318_s16, %s2856_s20 }
  0x12   : > { %p160_p6 = scmp.eq.s32.totalorder %s2386_s18, 1  ;;  %p57_p7 = scmp.eq.s32.totalorder %s52_s23, 0 }
  0x13   : > { %p2406_p8 = por %p73_p5, %p72_p3  ;;  %p166_p10 = scmp.eq.s32.totalorder %s1706_s19, 1 }
  0x14   : > { %p2410_p9 = por %p160_p6, %p66_p1  ;;  %p2019_p13 = scmp.lt.s32.totalorder %s2322_s17, 2 }
  0x15   : > { %s2833_s24 = scalar_select %p2406_p8, 1, 0 }
  0x16   : > { %s2834_s25 = scalar_select %p2410_p9, 1, 0 }
  0x17   : > { %s2415_s26 = scalar_select %p57_p7, %s2310_s14, %s59_s21  }
  0x18   : > { %p2417_p11 = por %p166_p10, %p72_p3  ;;  %s2819_s28 = sand.u32 1, %s2310_s14  }
  0x19   : > { %s2426_s29 = sshll.u32 %s2819_s28, 4  ;;  %s2429_s30 = smul.u32 768, %s2318_s16 }
  0x1a   : > { %s2835_s27 = scalar_select %p2417_p11, 1, 0 }
  0x1b   : > { %p2433_p0 = pnand %p2019_p13, %p2398_p4  ;;  %s210_s5 = sand.u32 1, %s2322_s17  }
  0x1c   : > { %s2837_s1 = sld [smem:[#allocation18_spill]]  ;;  %s214_s10 = scalar_lea.vmem [#allocation8], %s2426_s29 }
  0x1d   : > { %s225_s11 = sshll.u32 %s214_s10, 4  ;;  %s2448_s19 = scalar_lea.sflag [#allocation9], %s210_s5  ;;  %s2445_s11 = int_to_ptr.vmem [resolvable:$true] %s225_s11 }
  0x1e   : > { %p2453_p3 = pneg %p2433_p0 }
  0x22   : > { %s1604_s8 = scalar_lea.hbm %s2837_s1, %s2429_s30  ;;  %s2149_s7 = scalar_lea.hbm %s2837_s1, 1536 }
  0x23   : > { %s2442_s9 = scalar_lea.hbm %s1604_s8, 256  ;;  %s2174_s21 = scalar_lea.hbm %s1604_s8, 512 }
  0x24   : > { %p2145_p2 = scmp.ne.s32.totalorder %s2442_s9, %s2174_s21  ;;  %p2150_p6 = scmp.lt.u32.totalorder %s2442_s9, %s2837_s1 }
  0x25   : > { %p2151_p7 = scmp.lt.u32.totalorder %s2149_s7, %s2174_s21  ;;  %p2153_p13 = scmp.lt.u32.totalorder %s2174_s21, %s2442_s9 }
  0x26   : > { %p2147_p4 = pnand %p2453_p3, %p2145_p2 }
  0x27   : > { %p2152_p10 = por %p2151_p7, %p2150_p6 }
  0x28   : > { %p2148_p5 = pneg %p2147_p4 }
  0x29   : > { %p2154_p12 = por %p2153_p13, %p2152_p10 }
  0x2b   : > { %p2155_p1 = pnand %p2154_p12, %p2148_p5 }
  0x2d   : > { %2158 = shalt.err (!%p2155_p1)
}
  0x2e   : > { %s2159_s5 = scalar_lea.vmem %s2445_s11, 256  ;;  %s2324_s8 = smov [#allocation8]  }
  0x2f   : > { %p2160_p2 = scmp.ne.s32.totalorder %s2445_s11, %s2159_s5  ;;  %s2164_s23 = sshll.u32 %s2324_s8, 4  ;;  %s2165_s23 = int_to_ptr.vmem [resolvable:$false] %s2164_s23 }
  0x30   : > { %s2166_s28 = scalar_lea.vmem %s2165_s23, 512  ;;  %p2167_p9 = scmp.lt.s32.totalorder %s2445_s11, %s2165_s23 }
  0x31   : > { %p2162_p4 = pnand %p2160_p2, %p2453_p3  ;;  %p2168_p8 = scmp.lt.s32.totalorder %s2166_s28, %s2159_s5 }
  0x33   : > { %p2163_p11 = pneg %p2162_p4  ;;  %p2169_p6 = por %p2168_p8, %p2167_p9 }
  0x35   : > { %p2170_p7 = pnand %p2169_p6, %p2163_p11 }
  0x37   : > { %2173 = shalt.err (!%p2170_p7)
}
  0x38   : > { %s2822_s21 = smov 128   ;;  %s2824_s6 = smov 8  }
  0x39   : > { %2011 = dma.hbm_to_vmem [thread:$0]  (!%p2433_p0), %s2442_s9, 256, %s2445_s11, %s2448_s19, %s2822_s21, %s2822_s21, %s2824_s6  }
  0x3a   : > { %p258_p8 = scmp.lt.s32.totalorder %s2322_s17, 3  ;;  %p2839_p9 = scmp.ge.s32.totalorder %s2322_s17, 1 }
  0x3b   : > { %s2841_s0 = sld [smem:[#allocation17_spill]]  ;;  %s190_s23 = scalar_lea.vmem [#allocation5], %s2426_s29 }
  0x3c   : > { %p2483_p11 = pnand %p2839_p9, %p258_p8  ;;  %s200_s28 = sshll.u32 %s190_s23, 4  ;;  %s2494_s28 = int_to_ptr.vmem [resolvable:$true] %s200_s28 }
  0x3d   : > { %s2842_s9 = sand.u32 1, %s2310_s14  }
  0x3e   : > { %s2840_s7 = scalar_select %p2483_p11, 1, 0 }
  0x3f   : > { %s2498_s11 = scalar_lea.sflag [#allocation6], %s2842_s9 }
  0x41   : > { %s2491_s8 = scalar_lea.hbm %s2841_s0, %s2429_s30  ;;  %s2180_s5 = scalar_lea.hbm %s2841_s0, 1536 }
  0x42   : > { %s2175_s21 = scalar_lea.hbm %s2491_s8, 256  ;;  %p2181_p10 = scmp.lt.u32.totalorder %s2491_s8, %s2841_s0 }
  0x43   : > { %p2176_p12 = scmp.ne.s32.totalorder %s2491_s8, %s2175_s21  ;;  %p2182_p13 = scmp.lt.u32.totalorder %s2180_s5, %s2175_s21 }
  0x44   : > { %p2184_p4 = scmp.lt.u32.totalorder %s2175_s21, %s2491_s8 }
  0x45   : > { %p2178_p1 = pnand %p2176_p12, %p2453_p3  ;;  %p2183_p2 = por %p2182_p13, %p2181_p10 }
  0x47   : > { %p2179_p5 = pneg %p2178_p1  ;;  %p2185_p6 = por %p2184_p4, %p2183_p2 }
  0x49   : > { %p2186_p7 = pnand %p2185_p6, %p2179_p5 }
  0x4b   : > { %2189 = shalt.err (!%p2186_p7)
}
  0x4c   : > { %s2190_s23 = scalar_lea.vmem %s2494_s28, 256  ;;  %s2327_s6 = smov [#allocation5]  }
  0x4d   : > { %p2191_p8 = scmp.ne.s32.totalorder %s2494_s28, %s2190_s23  ;;  %s2195_s9 = sshll.u32 %s2327_s6, 4  ;;  %s2196_s9 = int_to_ptr.vmem [resolvable:$false] %s2195_s9 }
  0x4e   : > { %s2197_s1 = scalar_lea.vmem %s2196_s9, 512  ;;  %p2198_p1 = scmp.lt.s32.totalorder %s2494_s28, %s2196_s9 }
  0x4f   : > { %p2193_p9 = pnand %p2191_p8, %p2453_p3  ;;  %p2199_p11 = scmp.lt.s32.totalorder %s2197_s1, %s2190_s23 }
  0x51   : > { %p2194_p12 = pneg %p2193_p9  ;;  %p2200_p10 = por %p2199_p11, %p2198_p1 }
  0x53   : > { %p2201_p13 = pnand %p2200_p10, %p2194_p12 }
  0x55   : > { %2204 = shalt.err (!%p2201_p13)
}
  0x56   : > { %s2843_s20 = smov 8   ;;  %s2844_s21 = smov 128  }
  0x57   : > { %2008 = dma.hbm_to_vmem [thread:$0]  (!%p2433_p0), %s2491_s8, 256, %s2494_s28, %s2498_s11, %s2844_s21, %s2844_s21, %s2843_s20  }
  0x58   : > { %s1614_s6 = scalar_lea.hbm %s2817_s2, %s2429_s30  ;;  %s239_s23 = scalar_lea.vmem [#allocation10], %s2426_s29 }
  0x59   : > { %s250_s9 = sshll.u32 %s239_s23, 4  ;;  %s2530_s1 = scalar_lea.hbm %s1614_s6, 512  ;;  %s2532_s9 = int_to_ptr.vmem [resolvable:$true] %s250_s9 }
  0x5a   : > { %s2235_s0 = scalar_lea.hbm %s1614_s6, 768  ;;  %s2210_s28 = scalar_lea.hbm %s2817_s2, 1536 }
  0x5b   : > { %p2206_p11 = scmp.ne.s32.totalorder %s2530_s1, %s2235_s0  ;;  %p2211_p4 = scmp.lt.u32.totalorder %s2530_s1, %s2817_s2 }
  0x5c   : > { %p2212_p6 = scmp.lt.u32.totalorder %s2210_s28, %s2235_s0  ;;  %p2214_p8 = scmp.lt.u32.totalorder %s2235_s0, %s2530_s1 }
  0x5d   : > { %p2208_p5 = pnand %p2206_p11, %p2453_p3 }
  0x5e   : > { %p2213_p7 = por %p2212_p6, %p2211_p4 }
  0x5f   : > { %p2209_p2 = pneg %p2208_p5 }
  0x60   : > { %p2215_p9 = por %p2214_p8, %p2213_p7 }
  0x62   : > { %p2216_p12 = pnand %p2215_p9, %p2209_p2 }
  0x64   : > { %2219 = shalt.err (!%p2216_p12)
}
  0x65   : > { %s2220_s29 = scalar_lea.vmem %s2532_s9, 256  ;;  %s2328_s16 = smov [#allocation10]  }
  0x66   : > { %p2221_p1 = scmp.ne.s32.totalorder %s2532_s9, %s2220_s29  ;;  %s2225_s10 = sshll.u32 %s2328_s16, 4  ;;  %s2226_s10 = int_to_ptr.vmem [resolvable:$false] %s2225_s10 }
  0x67   : > { %s2227_s5 = scalar_lea.vmem %s2226_s10, 512  ;;  %p2228_p11 = scmp.lt.s32.totalorder %s2532_s9, %s2226_s10 }
  0x68   : > { %p2223_p10 = pnand %p2221_p1, %p2453_p3  ;;  %p2229_p5 = scmp.lt.s32.totalorder %s2227_s5, %s2220_s29 }
  0x6a   : > { %p2224_p13 = pneg %p2223_p10  ;;  %p2230_p4 = por %p2229_p5, %p2228_p11 }
  0x6c   : > { %p2231_p6 = pnand %p2230_p4, %p2224_p13 }
  0x6e   : > { %2234 = shalt.err (!%p2231_p6)
}
  0x6f   : > { %2014 = dma.hbm_to_vmem [thread:$0]  (!%p2433_p0), %s2530_s1, 256, %s2532_s9, %s2448_s19, %s2844_s21, %s2844_s21, %s2843_s20  }
  0x70   : > { %p2845_p3 = scmp.ne.s32.totalorder %s2840_s7, 0 }
  0x71   : > { %s2561_s0 = sand.u32 (!%p2845_p3), 1, %s2306_s13   ;;  %p2846_p2 = scmp.ne.s32.totalorder (!%p2845_p3), %s2833_s24, 0 }
  0x72   : > { %262 = sbr.rel (%p2845_p3) target bundleno = 892 (0x37c), region = 32  ;;  %s2564_s22 = sshll.u32 (!%p2845_p3), %s2561_s0, 4 }
  0x73   : > { %s265_s4 = scalar_lea.sflag (!%p2845_p3), [#allocation6], %s2561_s0  ;;  %s268_s6 = scalar_lea.vmem (!%p2845_p3), [#allocation5], %s2564_s22 }
  0x79   : > { %2289 = dma.done.wait (%p2846_p2), %s265_s4, 256  }
  0x7a   : > { %2291 = vsyncadd (%p2846_p2), %s265_s4, 4294967040  ;;  %s273_s19 = sand.u32 1, %s2386_s18   ;;  %s277_s20 = scalar_lea.vmem [#allocation8], %s2564_s22 }
  0x7b   : > { %s274_s7 = scalar_lea.sflag [#allocation9], %s273_s19 }
  0x7c   : > { %2293 = dma.done.wait (%p2846_p2), %s274_s7, 512  }
  0x7d   : > { %2295 = vsyncadd (%p2846_p2), %s274_s7, 4294966784  ;;  %v325_v0 = vld [vmem:[%s277_s20] sm:$0xff]  ;;  %v326_v3 = vld [vmem:[%s277_s20 + $0x8] sm:$0xff]  ;;  %vm430_vm0 = vcmask 64512   ;;  %v2329_v38 = vmov 0.0|0.0   ;;  %vm2330_vm1 = vmmov 0  }
  0x7e   : > { %v329_v1 = vmul.f32 0.35355338, %v325_v0  ;;  %v323_v2 = vld [vmem:[%s268_s6] sm:$0xff]  ;;  %v330_v4 = vmul.f32 0.35355338, %v326_v3  ;;  %v324_v5 = vld [vmem:[%s268_s6 + $0x8] sm:$0xff] }
  0x7f   : > { %1826 = vmatprep.subr.mxu0 %v323_v2  ;;  %1852 = vmatprep.subr.mxu1 %v324_v5  ;;  %v2331_v47 = vmov 0.0   ;;  %s286_s18 = scalar_lea.vmem [#allocation10], %s2564_s22  ;;  %s318_s24 = scalar_lea.vmem [#allocation11], %s2564_s22 }
  0x80   : > { %398 = vxpose.xlu0.b32.start.end [1/1] (short) %v329_v1, 128  ;;  %1827 = vmatpush3.msra.mxu0 %v323_v2  ;;  %s1557_s21 = sshll.u32 %s318_s24, 4  ;;  %s1757_s23 = sshll.u32 %s2314_s15, 8  ;;  %s2761_s21 = int_to_ptr.vmem [resolvable:$true] %s1557_s21 }
  0x81   : > { %1853 = vmatpush3.msra.mxu1 %v324_v5  ;;  %1948 = vmatprep.subr.bf16.mxu0 %v2329_v38  ;;  %s2766_s8 = scalar_lea.hbm %s2818_s3, %s1757_s23  ;;  %s1541_s28 = scalar_lea.sflag [#allocation7], %s2561_s0 }
  0x82   : > { %1972 = vmatprep.subr.bf16.mxu1 %v2329_v38  ;;  %s2236_s11 = scalar_lea.vmem %s2761_s21, 256  ;;  %p2847_p7 = scmp.ne.s32.totalorder %s2834_s25, 0 }
  0x83   : > { %p2237_p0 = scmp.ne.s32.totalorder %s2761_s21, %s2236_s11  ;;  %s2332_s15 = smov [#allocation11]  }
  0x84   : > { %s2240_s30 = sshll.u32 %s2332_s15, 4  ;;  %s2241_s30 = int_to_ptr.vmem [resolvable:$false] %s2240_s30 }
  0x85   : > { %p2238_p8 = pnand %p2237_p0, %p2847_p7  ;;  %s2242_s29 = scalar_lea.vmem %s2241_s30, 512 }
  0x86   : > { %p2243_p12 = scmp.lt.s32.totalorder %s2761_s21, %s2241_s30  ;;  %p2244_p1 = scmp.lt.s32.totalorder %s2242_s29, %s2236_s11 }
  0x87   : > { %p2239_p9 = pneg %p2238_p8 }
  0x88   : > { %p2245_p10 = por %p2244_p1, %p2243_p12 }
  0x8a   : > { %p2246_p13 = pnand %p2245_p10, %p2239_p9 }
  0xbd   : > { %624 = vxpose.xlu0.b32.start.end [1/1] (short) %v330_v4, 128 }
 0x100   : > { %v414_v6 = vpop.trf.xlu0 }
 0x101   : > { %1828 = vmatprep.mubr.msk.f32.mxu0 %vm430_vm0, %v414_v6 }
 0x104   : > { %v415_v7 = vpop.trf.xlu0 }
 0x105   : > { %1829 = vmatmul.mubr.msk.f32.vlgmr.msra.gmra.mrb[0].mxu0 %vm430_vm0, %v415_v7 }
 0x108   : > { %v416_v8 = vpop.trf.xlu0 }
 0x109   : > { %1831 = vmatprep.mubr.msk.f32.mxu0 %vm430_vm0, %v416_v8 }
 0x10c   : > { %v417_v9 = vpop.trf.xlu0 }
 0x10d   : > { %1832 = vmatmul.mubr.msk.f32.gmra.mrb[2].mxu0 %vm430_vm0, %v417_v9 }
 0x110   : > { %v418_v10 = vpop.trf.xlu0 }
 0x111   : > { %1834 = vmatprep.mubr.msk.f32.mxu0 %vm430_vm0, %v418_v10 }
 0x114   : > { %v419_v11 = vpop.trf.xlu0 }
 0x115   : > { %1835 = vmatmul.mubr.msk.f32.gmra.mrb[4].mxu0 %vm430_vm0, %v419_v11 }
 0x118   : > { %v420_v12 = vpop.trf.xlu0 }
 0x119   : > { %1837 = vmatprep.mubr.msk.f32.mxu0 %vm430_vm0, %v420_v12 }
 0x11c   : > { %v421_v13 = vpop.trf.xlu0 }
 0x11d   : > { %1838 = vmatmul.mubr.msk.f32.gmra.mrb[6].mxu0 %vm430_vm0, %v421_v13 }
 0x120   : > { %v422_v14 = vpop.trf.xlu0 }
 0x121   : > { %1840 = vmatprep.mubr.msk.f32.mxu0 %vm430_vm0, %v422_v14 }
 0x124   : > { %v423_v15 = vpop.trf.xlu0 }
 0x125   : > { %1841 = vmatmul.mubr.msk.f32.gmra.mrb[8].mxu0 %vm430_vm0, %v423_v15 }
 0x128   : > { %v424_v16 = vpop.trf.xlu0 }
 0x129   : > { %1843 = vmatprep.mubr.msk.f32.mxu0 %vm430_vm0, %v424_v16 }
 0x12c   : > { %v425_v17 = vpop.trf.xlu0 }
 0x12d   : > { %1844 = vmatmul.mubr.msk.f32.gmra.mrb[10].mxu0 %vm430_vm0, %v425_v17 }
 0x130   : > { %v426_v18 = vpop.trf.xlu0 }
 0x131   : > { %1846 = vmatprep.mubr.msk.f32.mxu0 %vm430_vm0, %v426_v18 }
 0x134   : > { %v427_v19 = vpop.trf.xlu0 }
 0x135   : > { %1847 = vmatmul.mubr.msk.f32.gmra.mrb[12].mxu0 %vm430_vm0, %v427_v19 }
 0x138   : > { %v428_v20 = vpop.trf.xlu0 }
 0x139   : > { %1849 = vmatprep.mubr.msk.f32.mxu0 %vm430_vm0, %v428_v20 }
 0x13c   : > { %v429_v21 = vpop.trf.xlu0 }
 0x13d   : > { %1850 = vmatmul.mubr.msk.f32.gmra.mrb[14].mxu0 %vm430_vm0, %v429_v21 }
 0x13e   : > { %1910 = vmatprep.mubr.msk.f32.mxu0 %vm2330_vm1, %v2331_v47 }
 0x140   : > { %v640_v22 = vpop.trf.xlu0 }
 0x141   : > { %1854 = vmatprep.mubr.msk.f32.mxu1 %vm430_vm0, %v640_v22 }
 0x144   : > { %v641_v23 = vpop.trf.xlu0 }
 0x145   : > { %1855 = vmatmul.mubr.msk.f32.vlgmr.msra.gmra.mrb[0].mxu1 %vm430_vm0, %v641_v23 }
 0x148   : > { %v642_v24 = vpop.trf.xlu0 }
 0x149   : > { %1857 = vmatprep.mubr.msk.f32.mxu1 %vm430_vm0, %v642_v24 }
 0x14c   : > { %v643_v25 = vpop.trf.xlu0 }
 0x14d   : > { %1858 = vmatmul.mubr.msk.f32.gmra.mrb[2].mxu1 %vm430_vm0, %v643_v25 }
 0x150   : > { %v644_v26 = vpop.trf.xlu0 }
 0x151   : > { %1860 = vmatprep.mubr.msk.f32.mxu1 %vm430_vm0, %v644_v26 }
 0x154   : > { %v645_v27 = vpop.trf.xlu0 }
 0x155   : > { %1861 = vmatmul.mubr.msk.f32.gmra.mrb[4].mxu1 %vm430_vm0, %v645_v27 }
 0x158   : > { %v646_v28 = vpop.trf.xlu0 }
 0x159   : > { %1863 = vmatprep.mubr.msk.f32.mxu1 %vm430_vm0, %v646_v28 }
 0x15c   : > { %v647_v29 = vpop.trf.xlu0 }
 0x15d   : > { %1864 = vmatmul.mubr.msk.f32.gmra.mrb[6].mxu1 %vm430_vm0, %v647_v29 }
 0x160   : > { %v648_v30 = vpop.trf.xlu0 }
 0x161   : > { %1866 = vmatprep.mubr.msk.f32.mxu1 %vm430_vm0, %v648_v30 }
 0x164   : > { %v649_v31 = vpop.trf.xlu0 }
 0x165   : > { %1867 = vmatmul.mubr.msk.f32.gmra.mrb[8].mxu1 %vm430_vm0, %v649_v31 }
 0x168   : > { %v650_v32 = vpop.trf.xlu0 }
 0x169   : > { %1869 = vmatprep.mubr.msk.f32.mxu1 %vm430_vm0, %v650_v32 }
 0x16c   : > { %v651_v33 = vpop.trf.xlu0 }
 0x16d   : > { %1870 = vmatmul.mubr.msk.f32.gmra.mrb[10].mxu1 %vm430_vm0, %v651_v33 }
 0x170   : > { %v652_v34 = vpop.trf.xlu0 }
 0x171   : > { %1872 = vmatprep.mubr.msk.f32.mxu1 %vm430_vm0, %v652_v34 }
 0x174   : > { %v653_v35 = vpop.trf.xlu0 }
 0x175   : > { %1873 = vmatmul.mubr.msk.f32.gmra.mrb[12].mxu1 %vm430_vm0, %v653_v35 }
 0x178   : > { %v654_v36 = vpop.trf.xlu0 }
 0x179   : > { %1875 = vmatprep.mubr.msk.f32.mxu1 %vm430_vm0, %v654_v36 }
 0x17c   : > { %v655_v37 = vpop.trf.xlu0 }
 0x17d   : > { %1876 = vmatmul.mubr.msk.f32.gmra.mrb[14].mxu1 %vm430_vm0, %v655_v37 }
 0x17e   : > { %1945 = vmatprep.mubr.msk.f32.mxu1 %vm2330_vm1, %v2331_v47 }
 0x1d8   : > { %v2612_v39 = vpop.f32.mrb[0].mxu0 }
 0x1d9   : > { %v2614_v40 = vpop.f32.mrb[1].mxu0 }
 0x1e0   : > { %v1833_v41 = vpop.f32.mrb[2].mxu0 }
 0x1e1   : > { %v2616_v42 = vadd.f32 -1e+30, %v1833_v41  ;;  %v555_v43 = vpop.f32.mrb[3].mxu0 }
 0x1e2   : > { %v2618_v44 = vadd.f32 -1e+30, %v555_v43 }
 0x1e3   : > { %v850_v45 = vmax.f32 %v2612_v39, %v2616_v42 }
 0x1e4   : > { %v849_v46 = vmax.f32 %v2614_v40, %v2618_v44 }
 0x1e8   : > { %v1836_v48 = vpop.f32.mrb[4].mxu0 }
 0x1e9   : > { %v2624_v49 = vadd.f32 -1e+30, %v1836_v48  ;;  %v565_v50 = vpop.f32.mrb[5].mxu0 }
 0x1ea   : > { %v2626_v51 = vadd.f32 -1e+30, %v565_v50 }
 0x1eb   : > { %v852_v52 = vmax.f32 %v850_v45, %v2624_v49 }
 0x1ec   : > { %v851_v53 = vmax.f32 %v849_v46, %v2626_v51 }
 0x1f0   : > { %v1839_v54 = vpop.f32.mrb[6].mxu0 }
 0x1f1   : > { %v2630_v55 = vadd.f32 -1e+30, %v1839_v54  ;;  %v575_v56 = vpop.f32.mrb[7].mxu0 }
 0x1f2   : > { %v2632_v57 = vadd.f32 -1e+30, %v575_v56 }
 0x1f3   : > { %v854_v58 = vmax.f32 %v852_v52, %v2630_v55 }
 0x1f4   : > { %v853_v59 = vmax.f32 %v851_v53, %v2632_v57 }
 0x1f8   : > { %v1842_v60 = vpop.f32.mrb[8].mxu0 }
 0x1f9   : > { %v2636_v61 = vadd.f32 -1e+30, %v1842_v60  ;;  %v585_v62 = vpop.f32.mrb[9].mxu0 }
 0x1fa   : > { %v2638_v63 = vadd.f32 -1e+30, %v585_v62 }
 0x1fb   : > { %v856_v0 = vmax.f32 %v854_v58, %v2636_v61 }
 0x1fc   : > { %v855_v1 = vmax.f32 %v853_v59, %v2638_v63 }
 0x200   : > { %v1845_v2 = vpop.f32.mrb[10].mxu0 }
 0x201   : > { %v2642_v3 = vadd.f32 -1e+30, %v1845_v2  ;;  %v595_v4 = vpop.f32.mrb[11].mxu0 }
 0x202   : > { %v2644_v5 = vadd.f32 -1e+30, %v595_v4 }
 0x203   : > { %v858_v6 = vmax.f32 %v856_v0, %v2642_v3 }
 0x204   : > { %v857_v7 = vmax.f32 %v855_v1, %v2644_v5 }
 0x208   : > { %v1848_v8 = vpop.f32.mrb[12].mxu0 }
 0x209   : > { %v2648_v9 = vadd.f32 -1e+30, %v1848_v8  ;;  %v605_v10 = vpop.f32.mrb[13].mxu0 }
 0x20a   : > { %v2650_v11 = vadd.f32 -1e+30, %v605_v10 }
 0x20b   : > { %v860_v12 = vmax.f32 %v858_v6, %v2648_v9 }
 0x20c   : > { %v859_v13 = vmax.f32 %v857_v7, %v2650_v11 }
 0x210   : > { %v1851_v14 = vpop.f32.mrb[14].mxu0 }
 0x211   : > { %v2654_v15 = vadd.f32 -1e+30, %v1851_v14  ;;  %v615_v16 = vpop.f32.mrb[15].mxu0 }
 0x212   : > { %v2656_v17 = vadd.f32 -1e+30, %v615_v16 }
 0x213   : > { %v862_v18 = vmax.f32 %v860_v12, %v2654_v15 }
 0x214   : > { %v861_v19 = vmax.f32 %v859_v13, %v2656_v17 }
 0x216   : > { %v863_v20 = vmax.f32 %v861_v19, %v862_v18 }
 0x218   : > { %v864_v21 = vrot.slane %v863_v20, 4  ;;  %v2660_v22 = vpop.f32.mrb[0].mxu1 }
 0x219   : > { %v2662_v23 = vpop.f32.mrb[1].mxu1 }
 0x21a   : > { %v865_v24 = vmax.f32 %v863_v20, %v864_v21 }
 0x21c   : > { %v866_v25 = vrot.slane %v865_v24, 2 }
 0x21e   : > { %v867_v26 = vmax.f32 %v865_v24, %v866_v25 }
 0x220   : > { %v868_v27 = vrot.slane %v867_v26, 1  ;;  %v1859_v28 = vpop.f32.mrb[2].mxu1 }
 0x221   : > { %v2664_v29 = vadd.f32 -1e+30, %v1859_v28  ;;  %v780_v30 = vpop.f32.mrb[3].mxu1 }
 0x222   : > { %v869_v31 = vmax.f32 %v867_v26, %v868_v27  ;;  %v2668_v33 = vadd.f32 -1e+30, %v780_v30 }
 0x223   : > { %v871_v32 = vmax.f32 %v2660_v22, %v2664_v29 }
 0x224   : > { %v895_v34 = vsub.f32 %v2614_v40, %v869_v31  ;;  %v896_v35 = vsub.f32 %v2612_v39, %v869_v31  ;;  %v897_v36 = vsub.f32 %v2618_v44, %v869_v31  ;;  %v898_v37 = vsub.f32 %v2616_v42, %v869_v31 }
 0x225   : > { %v899_v41 = vsub.f32 %v2626_v51, %v869_v31  ;;  %v900_v43 = vsub.f32 %v2624_v49, %v869_v31  ;;  %v901_v45 = vsub.f32 %v2632_v57, %v869_v31  ;;  %v902_v46 = vsub.f32 %v2630_v55, %v869_v31 }
 0x226   : > { %v903_v47 = vsub.f32 %v2638_v63, %v869_v31  ;;  %v904_v48 = vsub.f32 %v2636_v61, %v869_v31  ;;  %v905_v40 = vsub.f32 %v2644_v5, %v869_v31  ;;  %v906_v39 = vsub.f32 %v2642_v3, %v869_v31 }
 0x227   : > { %v907_v44 = vsub.f32 %v2650_v11, %v869_v31  ;;  %v908_v42 = vsub.f32 %v2648_v9, %v869_v31  ;;  %v909_v50 = vsub.f32 %v2656_v17, %v869_v31  ;;  %v910_v49 = vsub.f32 %v2654_v15, %v869_v31 }
 0x228   : > { %v927_v51 = vmul.f32 1.442695, %v895_v34  ;;  %v929_v52 = vmul.f32 1.442695, %v896_v35  ;;  %v931_v53 = vmul.f32 1.442695, %v897_v36  ;;  %v870_v54 = vmax.f32 %v2662_v23, %v2668_v33 }
 0x229   : > { %v933_v55 = vmul.f32 1.442695, %v898_v37  ;;  %v935_v56 = vmul.f32 1.442695, %v899_v41  ;;  %v937_v57 = vmul.f32 1.442695, %v900_v43 }
 0x22a   : > { %2076 = vpow2.f32 %v927_v51  ;;  %v939_v58 = vmul.f32 1.442695, %v901_v45  ;;  %v941_v59 = vmul.f32 1.442695, %v902_v46  ;;  %v1862_v60 = vpop.f32.mrb[4].mxu1 }
 0x22b   : > { %2078 = vpow2.f32 %v929_v52  ;;  %v943_v61 = vmul.f32 1.442695, %v903_v47  ;;  %v2688_v62 = vadd.f32 -1e+30, %v1862_v60  ;;  %v790_v63 = vpop.f32.mrb[5].mxu1 }
 0x22c   : > { %2080 = vpow2.f32 %v931_v53  ;;  %v945_v0 = vmul.f32 1.442695, %v904_v48  ;;  %v2690_v1 = vadd.f32 -1e+30, %v790_v63  ;;  %v947_v2 = vmul.f32 1.442695, %v905_v40 }
 0x22d   : > { %2082 = vpow2.f32 %v933_v55  ;;  %v873_v3 = vmax.f32 %v871_v32, %v2688_v62  ;;  %v949_v5 = vmul.f32 1.442695, %v906_v39  ;;  %v951_v9 = vmul.f32 1.442695, %v907_v44 }
 0x22e   : > { %2084 = vpow2.f32 %v935_v56  ;;  %v872_v6 = vmax.f32 %v870_v54, %v2690_v1  ;;  %v953_v11 = vmul.f32 1.442695, %v908_v42  ;;  %v955_v14 = vmul.f32 1.442695, %v909_v50 }
 0x22f   : > { %2086 = vpow2.f32 %v937_v57  ;;  %v957_v17 = vmul.f32 1.442695, %v910_v49 }
 0x230   : > { %2088 = vpow2.f32 %v939_v58  ;;  %v1865_v4 = vpop.f32.mrb[6].mxu1 }
 0x231   : > { %2090 = vpow2.f32 %v941_v59  ;;  %v2694_v7 = vadd.f32 -1e+30, %v1865_v4  ;;  %v800_v8 = vpop.f32.mrb[7].mxu1 }
 0x232   : > { %2092 = vpow2.f32 %v943_v61  ;;  %v2696_v10 = vadd.f32 -1e+30, %v800_v8 }
 0x233   : > { %2094 = vpow2.f32 %v945_v0  ;;  %v875_v12 = vmax.f32 %v873_v3, %v2694_v7 }
 0x234   : > { %v2077_v13 = vpop.eup %2076  ;;  %2096 = vpow2.f32 %v947_v2  ;;  %v874_v15 = vmax.f32 %v872_v6, %v2696_v10 }
 0x235   : > { %v2079_v16 = vpop.eup %2078  ;;  %2098 = vpow2.f32 %v949_v5 }
 0x236   : > { %v2081_v18 = vpop.eup %2080  ;;  %2100 = vpow2.f32 %v951_v9  ;;  %v993_v19 = vadd.f32 %v2079_v16, %v2077_v13  ;;  %v1949_v20 = vpack.c.bf16 %v2079_v16, %v2077_v13 }
 0x237   : > { %v2083_v21 = vpop.eup %2082  ;;  %2102 = vpow2.f32 %v953_v11 }
 0x238   : > { %v2085_v24 = vpop.eup %2084  ;;  %2104 = vpow2.f32 %v955_v14  ;;  %v994_v25 = vadd.f32 %v2081_v18, %v993_v19  ;;  %1950 = vmatpush3.bf16.msra.mxu0 %v1949_v20  ;;  %v1868_v26 = vpop.f32.mrb[8].mxu1  ;;  %v1952_v27 = vpack.c.bf16 %v2083_v21, %v2081_v18 }
 0x239   : > { %v2087_v28 = vpop.eup %2086  ;;  %2106 = vpow2.f32 %v957_v17  ;;  %v2700_v30 = vadd.f32 -1e+30, %v1868_v26  ;;  %1951 = vmatprep.subr.bf16.mxu0 %v2329_v38  ;;  %v810_v31 = vpop.f32.mrb[9].mxu1 }
 0x23a   : > { %v2089_v32 = vpop.eup %2088  ;;  %v995_v34 = vadd.f32 %v2083_v21, %v994_v25  ;;  %v2703_v35 = vadd.f32 -1e+30, %v810_v31  ;;  %v1955_v36 = vpack.c.bf16 %v2087_v28, %v2085_v24 }
 0x23b   : > { %v2091_v37 = vpop.eup %2090  ;;  %v877_v41 = vmax.f32 %v875_v12, %v2700_v30 }
 0x23c   : > { %v2093_v43 = vpop.eup %2092  ;;  %v996_v45 = vadd.f32 %v2085_v24, %v995_v34  ;;  %v876_v46 = vmax.f32 %v874_v15, %v2703_v35  ;;  %1953 = vmatpush3.bf16.msra.mxu0 %v1952_v27  ;;  %v1958_v47 = vpack.c.bf16 %v2091_v37, %v2089_v32  ;;  %v327_v27 = vld [vmem:[%s286_s18] sm:$0xff] }
 0x23d   : > { %v2095_v48 = vpop.eup %2094  ;;  %1954 = vmatprep.subr.bf16.mxu0 %v2329_v38 }
 0x23e   : > { %v2097_v40 = vpop.eup %2096  ;;  %v997_v39 = vadd.f32 %v2087_v28, %v996_v45  ;;  %v1961_v44 = vpack.c.bf16 %v2095_v48, %v2093_v43 }
 0x23f   : > { %v2099_v42 = vpop.eup %2098 }
 0x240   : > { %v2101_v50 = vpop.eup %2100  ;;  %v998_v49 = vadd.f32 %v2089_v32, %v997_v39  ;;  %1956 = vmatpush3.bf16.msra.mxu0 %v1955_v36  ;;  %v1871_v51 = vpop.f32.mrb[10].mxu1  ;;  %v1964_v52 = vpack.c.bf16 %v2099_v42, %v2097_v40 }
 0x241   : > { %v2103_v53 = vpop.eup %2102  ;;  %v2708_v54 = vadd.f32 -1e+30, %v1871_v51  ;;  %1957 = vmatprep.subr.bf16.mxu0 %v2329_v38  ;;  %v820_v55 = vpop.f32.mrb[11].mxu1 }
 0x242   : > { %v2105_v56 = vpop.eup %2104  ;;  %v999_v57 = vadd.f32 %v2091_v37, %v998_v49  ;;  %v2711_v58 = vadd.f32 -1e+30, %v820_v55  ;;  %v1967_v59 = vpack.c.bf16 %v2103_v53, %v2101_v50 }
 0x243   : > { %v2107_v60 = vpop.eup %2106  ;;  %v879_v61 = vmax.f32 %v877_v41, %v2708_v54 }
 0x244   : > { %v1000_v63 = vadd.f32 %v2093_v43, %v999_v57  ;;  %v878_v0 = vmax.f32 %v876_v46, %v2711_v58  ;;  %1959 = vmatpush3.bf16.msra.mxu0 %v1958_v47  ;;  %v1970_v2 = vpack.c.bf16 %v2107_v60, %v2105_v56 }
 0x245   : > { %1960 = vmatprep.subr.bf16.mxu0 %v2329_v38 }
 0x246   : > { %v1001_v3 = vadd.f32 %v2095_v48, %v1000_v63 }
 0x248   : > { %v1002_v4 = vadd.f32 %v2097_v40, %v1001_v3  ;;  %1962 = vmatpush3.bf16.msra.mxu0 %v1961_v44  ;;  %v1874_v5 = vpop.f32.mrb[12].mxu1 }
 0x249   : > { %v2716_v6 = vadd.f32 -1e+30, %v1874_v5  ;;  %1963 = vmatprep.subr.bf16.mxu0 %v2329_v38  ;;  %v830_v8 = vpop.f32.mrb[13].mxu1 }
 0x24a   : > { %v1003_v9 = vadd.f32 %v2099_v42, %v1002_v4  ;;  %v2719_v11 = vadd.f32 -1e+30, %v830_v8 }
 0x24b   : > { %v881_v12 = vmax.f32 %v879_v61, %v2716_v6 }
 0x24c   : > { %v1004_v13 = vadd.f32 %v2101_v50, %v1003_v9  ;;  %v880_v14 = vmax.f32 %v878_v0, %v2719_v11  ;;  %1965 = vmatpush3.bf16.msra.mxu0 %v1964_v52 }
 0x24d   : > { %1966 = vmatprep.subr.bf16.mxu0 %v2329_v38 }
 0x24e   : > { %v1005_v15 = vadd.f32 %v2103_v53, %v1004_v13 }
 0x250   : > { %v1006_v16 = vadd.f32 %v2105_v56, %v1005_v15  ;;  %1968 = vmatpush3.bf16.msra.mxu0 %v1967_v59  ;;  %v1877_v17 = vpop.f32.mrb[14].mxu1 }
 0x251   : > { %v2724_v18 = vadd.f32 -1e+30, %v1877_v17  ;;  %1969 = vmatprep.subr.bf16.mxu0 %v2329_v38  ;;  %v840_v19 = vpop.f32.mrb[15].mxu1 }
 0x252   : > { %v1007_v20 = vadd.f32 %v2107_v60, %v1006_v16  ;;  %v2727_v21 = vadd.f32 -1e+30, %v840_v19 }
 0x253   : > { %v883_v24 = vmax.f32 %v881_v12, %v2724_v18 }
 0x254   : > { %v1008_v25 = vrot.slane %v1007_v20, 4  ;;  %v882_v26 = vmax.f32 %v880_v14, %v2727_v21  ;;  %1971 = vmatpush3.bf16.msra.mxu0 %v1970_v2 }
 0x256   : > { %v1009_v28 = vadd.f32 %v1008_v25, %v1007_v20  ;;  %v884_v31 = vmax.f32 %v882_v26, %v883_v24 }
 0x257   : > { %1911 = vmatmul.mubr.f32.vlgmr.msra.gmra.mrb[16].mxu0 %v327_v27 }
 0x258   : > { %v1010_v32 = vrot.slane %v1009_v28, 2  ;;  %v885_v34 = vrot.slane %v884_v31, 4 }
 0x25a   : > { %v1011_v36 = vadd.f32 %v1010_v32, %v1009_v28  ;;  %v886_v37 = vmax.f32 %v884_v31, %v885_v34 }
 0x25c   : > { %v1012_v41 = vrot.slane %v1011_v36, 1  ;;  %v887_v43 = vrot.slane %v886_v37, 2 }
 0x25e   : > { %v1013_v45 = vadd.f32 %v1012_v41, %v1011_v36  ;;  %v888_v46 = vmax.f32 %v886_v37, %v887_v43 }
 0x260   : > { %1035 = vst [vmem:[#allocation3] sm:$0x1] %v1013_v45  ;;  %v889_v47 = vrot.slane %v888_v46, 1 }
 0x262   : > { %v890_v48 = vmax.f32 %v888_v46, %v889_v47 }
 0x264   : > { %v911_v40 = vsub.f32 %v2662_v23, %v890_v48  ;;  %v912_v39 = vsub.f32 %v2660_v22, %v890_v48  ;;  %v913_v44 = vsub.f32 %v2668_v33, %v890_v48  ;;  %v914_v42 = vsub.f32 %v2664_v29, %v890_v48 }
 0x265   : > { %v915_v50 = vsub.f32 %v2690_v1, %v890_v48  ;;  %v916_v49 = vsub.f32 %v2688_v62, %v890_v48  ;;  %v917_v51 = vsub.f32 %v2696_v10, %v890_v48  ;;  %v918_v52 = vsub.f32 %v2694_v7, %v890_v48 }
 0x266   : > { %v919_v53 = vsub.f32 %v2703_v35, %v890_v48  ;;  %v920_v55 = vsub.f32 %v2700_v30, %v890_v48  ;;  %v921_v23 = vsub.f32 %v2711_v58, %v890_v48  ;;  %v922_v22 = vsub.f32 %v2708_v54, %v890_v48 }
 0x267   : > { %v923_v33 = vsub.f32 %v2719_v11, %v890_v48  ;;  %v924_v29 = vsub.f32 %v2716_v6, %v890_v48  ;;  %v925_v1 = vsub.f32 %v2727_v21, %v890_v48  ;;  %v926_v62 = vsub.f32 %v2724_v18, %v890_v48 }
 0x268   : > { %v959_v56 = vmul.f32 1.442695, %v911_v40  ;;  %v961_v10 = vmul.f32 1.442695, %v912_v39  ;;  %v963_v57 = vmul.f32 1.442695, %v913_v44 }
 0x269   : > { %v965_v7 = vmul.f32 1.442695, %v914_v42  ;;  %v967_v35 = vmul.f32 1.442695, %v915_v50  ;;  %v969_v30 = vmul.f32 1.442695, %v916_v49 }
 0x26a   : > { %2108 = vpow2.f32 %v959_v56  ;;  %v971_v58 = vmul.f32 1.442695, %v917_v51  ;;  %v973_v54 = vmul.f32 1.442695, %v918_v52  ;;  %v975_v59 = vmul.f32 1.442695, %v919_v53 }
 0x26b   : > { %2110 = vpow2.f32 %v961_v10  ;;  %v977_v60 = vmul.f32 1.442695, %v920_v55  ;;  %v979_v61 = vmul.f32 1.442695, %v921_v23  ;;  %v981_v63 = vmul.f32 1.442695, %v922_v22 }
 0x26c   : > { %2112 = vpow2.f32 %v963_v57  ;;  %v983_v0 = vmul.f32 1.442695, %v923_v33  ;;  %v985_v2 = vmul.f32 1.442695, %v924_v29  ;;  %v987_v4 = vmul.f32 1.442695, %v925_v1 }
 0x26d   : > { %2114 = vpow2.f32 %v965_v7  ;;  %v989_v6 = vmul.f32 1.442695, %v926_v62  ;;  %v328_v55 = vld [vmem:[%s286_s18 + $0x8] sm:$0xff]  ;;  %v1526_v56 = vlaneseq }
 0x26e   : > { %2116 = vpow2.f32 %v967_v35  ;;  %v1516_v62 = vld [vmem:[#allocation3] sm:$0x1] }
 0x26f   : > { %2118 = vpow2.f32 %v969_v30  ;;  %v1527_v10 = vshrl.u32 %v1526_v56, 7 }
 0x270   : > { %2120 = vpow2.f32 %v971_v58 }
 0x271   : > { %2122 = vpow2.f32 %v973_v54  ;;  %v1528_v57 = vsub.s32 0, %v1527_v10 }
 0x272   : > { %2124 = vpow2.f32 %v975_v59 }
 0x273   : > { %2126 = vpow2.f32 %v977_v60 }
 0x274   : > { %v2109_v3 = vpop.eup %2108  ;;  %2128 = vpow2.f32 %v979_v61 }
 0x275   : > { %v2111_v5 = vpop.eup %2110  ;;  %2130 = vpow2.f32 %v981_v63 }
 0x276   : > { %v2113_v8 = vpop.eup %2112  ;;  %2132 = vpow2.f32 %v983_v0  ;;  %v1014_v9 = vadd.f32 %v2111_v5, %v2109_v3  ;;  %v1973_v11 = vpack.c.bf16 %v2111_v5, %v2109_v3 }
 0x277   : > { %v2115_v12 = vpop.eup %2114  ;;  %2134 = vpow2.f32 %v985_v2 }
 0x278   : > { %v2117_v13 = vpop.eup %2116  ;;  %2136 = vpow2.f32 %v987_v4  ;;  %v1015_v14 = vadd.f32 %v2113_v8, %v1014_v9  ;;  %1974 = vmatpush3.bf16.msra.mxu1 %v1973_v11  ;;  %v1976_v15 = vpack.c.bf16 %v2115_v12, %v2113_v8 }
 0x279   : > { %v2119_v16 = vpop.eup %2118  ;;  %2138 = vpow2.f32 %v989_v6  ;;  %1975 = vmatprep.subr.bf16.mxu1 %v2329_v38 }
 0x27a   : > { %v2121_v17 = vpop.eup %2120  ;;  %v1016_v18 = vadd.f32 %v2115_v12, %v1015_v14  ;;  %v1979_v19 = vpack.c.bf16 %v2119_v16, %v2117_v13  ;;  %2140 = vrcp.f32 %v1516_v62 }
 0x27b   : > { %v2123_v20 = vpop.eup %2122 }
 0x27c   : > { %v2125_v21 = vpop.eup %2124  ;;  %v1017_v24 = vadd.f32 %v2117_v13, %v1016_v18  ;;  %1977 = vmatpush3.bf16.msra.mxu1 %v1976_v15  ;;  %v1982_v25 = vpack.c.bf16 %v2123_v20, %v2121_v17 }
 0x27d   : > { %v2127_v26 = vpop.eup %2126  ;;  %1978 = vmatprep.subr.bf16.mxu1 %v2329_v38 }
 0x27e   : > { %v2129_v27 = vpop.eup %2128  ;;  %v1018_v28 = vadd.f32 %v2119_v16, %v1017_v24  ;;  %v1985_v31 = vpack.c.bf16 %v2127_v26, %v2125_v21 }
 0x27f   : > { %v2131_v32 = vpop.eup %2130 }
 0x280   : > { %v2133_v34 = vpop.eup %2132  ;;  %v1019_v36 = vadd.f32 %v2121_v17, %v1018_v28  ;;  %1980 = vmatpush3.bf16.msra.mxu1 %v1979_v19  ;;  %v1988_v37 = vpack.c.bf16 %v2131_v32, %v2129_v27 }
 0x281   : > { %v2135_v41 = vpop.eup %2134  ;;  %1981 = vmatprep.subr.bf16.mxu1 %v2329_v38 }
 0x282   : > { %v2137_v43 = vpop.eup %2136  ;;  %v1020_v45 = vadd.f32 %v2123_v20, %v1019_v36  ;;  %v1991_v46 = vpack.c.bf16 %v2135_v41, %v2133_v34 }
 0x283   : > { %v2139_v47 = vpop.eup %2138 }
 0x284   : > { %v1021_v48 = vadd.f32 %v2125_v21, %v1020_v45  ;;  %1983 = vmatpush3.bf16.msra.mxu1 %v1982_v25  ;;  %v1994_v40 = vpack.c.bf16 %v2139_v47, %v2137_v43 }
 0x285   : > { %1984 = vmatprep.subr.bf16.mxu1 %v2329_v38 }
 0x286   : > { %v1022_v39 = vadd.f32 %v2127_v26, %v1021_v48 }
 0x288   : > { %v1023_v44 = vadd.f32 %v2129_v27, %v1022_v39  ;;  %1986 = vmatpush3.bf16.msra.mxu1 %v1985_v31 }
 0x289   : > { %1987 = vmatprep.subr.bf16.mxu1 %v2329_v38 }
 0x28a   : > { %v1024_v42 = vadd.f32 %v2131_v32, %v1023_v44 }
 0x28c   : > { %v1025_v50 = vadd.f32 %v2133_v34, %v1024_v42  ;;  %1989 = vmatpush3.bf16.msra.mxu1 %v1988_v37 }
 0x28d   : > { %1990 = vmatprep.subr.bf16.mxu1 %v2329_v38 }
 0x28e   : > { %v1026_v49 = vadd.f32 %v2135_v41, %v1025_v50 }
 0x290   : > { %v1027_v51 = vadd.f32 %v2137_v43, %v1026_v49  ;;  %1992 = vmatpush3.bf16.msra.mxu1 %v1991_v46 }
 0x291   : > { %1993 = vmatprep.subr.bf16.mxu1 %v2329_v38  ;;  %v2141_v38 = vpop.eup %2140 }
 0x292   : > { %v1028_v52 = vadd.f32 %v2139_v47, %v1027_v51  ;;  %v1529_v7 = vrot.slane %v2141_v38, %v1528_v57 }
 0x294   : > { %v1029_v53 = vrot.slane %v1028_v52, 4  ;;  %1995 = vmatpush3.bf16.msra.mxu1 %v1994_v40 }
 0x296   : > { %v1030_v23 = vadd.f32 %v1029_v53, %v1028_v52 }
 0x297   : > { %1946 = vmatmul.mubr.f32.vlgmr.msra.gmra.mrb[16].mxu1 %v328_v55 }
 0x298   : > { %v1031_v22 = vrot.slane %v1030_v23, 2 }
 0x29a   : > { %v1032_v33 = vadd.f32 %v1031_v22, %v1030_v23 }
 0x29c   : > { %v1033_v29 = vrot.slane %v1032_v33, 1 }
 0x29e   : > { %v1034_v1 = vadd.f32 %v1033_v29, %v1032_v33 }
 0x2a0   : > { %1036 = vst [vmem:[#allocation3 + $0x1] sm:$0x1] %v1034_v1 }
 0x2a7   : > { %v1517_v54 = vld [vmem:[#allocation3 + $0x1] sm:$0x1] }
 0x2a8   : > { %2142 = vrcp.f32 %v1517_v54 }
 0x2b2   : > { %v2143_v59 = vpop.eup %2142 }
 0x2b3   : > { %v1533_v60 = vrot.slane %v2143_v59, %v1528_v57 }
 0x32a   : > { %v1103_v35 = vpop.f32.mrb[16].mxu0 }
 0x32b   : > { %v1536_v30 = vmul.f32 %v1529_v7, %v1103_v35  ;;  %v1912_v58 = vpop.f32.mrb[17].mxu0 }
 0x32d   : > { %1538 = vst [vmem:[%s318_s24] sm:$0xff] %v1536_v30 }
 0x36a   : > { %v1173_v61 = vpop.f32.mrb[16].mxu1 }
 0x36b   : > { %v1537_v63 = vmul.f32 %v1533_v60, %v1173_v61  ;;  %v1947_v0 = vpop.f32.mrb[17].mxu1 }
 0x36d   : > { %1539 = vst [vmem:[%s318_s24 + $0x8] sm:$0xff] %v1537_v63 }
 0x36e   : > { %2249 = shalt.err (!%p2246_p13)
}
 0x36f   : > { %s2250_s16 = scalar_lea.hbm %s2766_s8, 256  ;;  %s2254_s22 = scalar_lea.hbm %s2818_s3, 512 }
 0x370   : > { %p2251_p11 = scmp.ne.s32.totalorder %s2766_s8, %s2250_s16  ;;  %p2255_p6 = scmp.lt.u32.totalorder %s2766_s8, %s2818_s3 }
 0x371   : > { %p2256_p3 = scmp.lt.u32.totalorder %s2254_s22, %s2250_s16  ;;  %p2258_p0 = scmp.lt.u32.totalorder %s2250_s16, %s2766_s8 }
 0x372   : > { %p2252_p5 = pnand %p2251_p11, %p2847_p7 }
 0x373   : > { %p2257_p2 = por %p2256_p3, %p2255_p6 }
 0x374   : > { %p2253_p4 = pneg %p2252_p5 }
 0x375   : > { %p2259_p8 = por %p2258_p0, %p2257_p2 }
 0x377   : > { %p2260_p9 = pnand %p2259_p8, %p2253_p4 }
 0x379   : > { %2263 = shalt.err (!%p2260_p9)
}
 0x37a   : > { %s2333_s19 = smov 128   ;;  %s2334_s7 = smov 8  }
 0x37b   : > { %2003 = dma.vmem_to_hbm [thread:$0]  (%p2847_p7), %s2761_s21, 256, %s2766_s8, %s1541_s28, %s2333_s19, %s2333_s19, %s2334_s7  }
 0x37c PF: > { %s1572_s20 = sand.u32 1, %s2302_s12   ;;  %p2848_p12 = scmp.ne.s32.totalorder %s2835_s27, 0 }
 0x37d   : > { %p2849_p1 = scmp.ge.s32.totalorder %s2322_s17, 2  ;;  %s1573_s18 = scalar_lea.sflag [#allocation7], %s1572_s20 }
 0x37f   : > { %p2016_p10 = pnand %p2849_p1, %p2848_p12 }
 0x381   : > { %2297 = dma.done.wait (!%p2016_p10), %s1573_s18, 256  }
 0x382   : > { %2299 = vsyncadd (!%p2016_p10), %s1573_s18, 4294967040  ;;  %s22_s17 = sadd.s32 1, %s2322_s17   ;;  %s2850_s15 = sld [smem:[#allocation15_spill]] }
 0x383   : > { %p19_p13 = scmp.ge.s32.totalorder %s22_s17, 4   ;;  %s2851_s16 = sld [smem:[#allocation16_spill]] }
 0x384   : > { %s2852_s12 = smov %s2306_s13  ;;  %s2853_s13 = smov %s2310_s14 }
 0x385   : > { %s2854_s14 = smov %s2415_s26  ;;  %21 = sbr.rel (!%p19_p13) target bundleno = 11 (0xb), region = 113 }
 0x38c   :  { %1578 = vsyncpa [#allocation6], 1 }
 0x38d   :  { %1580 = vsyncpa [#allocation6 + $0x1], 1 }
 0x38e   :  { %1581 = vsyncpa [#allocation9], 1 }
 0x38f   :  { %1583 = vsyncpa [#allocation9 + $0x1], 1 }
 0x390   :  { %1584 = vsyncpa [#allocation7], 1 }
 0x391   :  { %1586 = vsyncpa [#allocation7 + $0x1], 1 }

</bundles_post_ra>
